<compile_context>
chip_gen: v6e
topology: v6e:2x2x1
jax: 0.10.0
libtpu: 0.0.40
codegen_flags: <defaults>
</compile_context>

<pallas_src>
import functools

import jax
import jax.numpy as jnp
from jax.experimental import pallas as pl
from jax.experimental.pallas import tpu as pltpu


def _gap_kernel(x_ref, o_ref, acc_ref, *, hw, hw_tile, ragged, inv_hw):
    # x_ref:   (n_tile, c_tile, hw_tile)  batch-tile x channel-tile x HW-tile
    # o_ref:   (n_tile, c_tile)           pooled means for this (n, c) block
    # acc_ref: (n_tile, c_tile) f32 VMEM  running sums across the HW grid axis
    t = pl.program_id(2)
    last = pl.num_programs(2) - 1

    @pl.when(t == 0)
    def _init():
        acc_ref[...] = jnp.zeros_like(acc_ref)

    if ragged:
        # Only the final HW tile is ragged; keep the steady state mask-free.
        @pl.when(t != last)
        def _full_tile():
            acc_ref[...] += jnp.sum(x_ref[...].astype(jnp.float32), axis=-1)

        @pl.when(t == last)
        def _ragged_tail():
            x = x_ref[...].astype(jnp.float32)
            col = jax.lax.broadcasted_iota(jnp.int32, x.shape, dimension=2)
            x = jnp.where(t * hw_tile + col < hw, x, 0.0)
            acc_ref[...] += jnp.sum(x, axis=-1)
    else:
        acc_ref[...] += jnp.sum(x_ref[...].astype(jnp.float32), axis=-1)

    @pl.when(t == last)
    def _finalize():
        o_ref[...] = (acc_ref[...] * inv_hw).astype(o_ref.dtype)


def _vmem_capacity_bytes():
    try:
        return int(pltpu.get_tpu_info().vmem_capacity_bytes)
    except Exception:
        return 64 << 20  # conservative fallback: v7x per-core VMEM


def _choose_tiles(N, C, HW, itemsize, budget):
    """Pick (n_tile, c_tile, hw_tile) so one input block stays near `budget`
    bytes while keeping every BlockSpec TPU-legal (lane dims: multiple of 128
    or full extent; sublane dims: multiple of 8 or full extent)."""
    per_batch = C * HW * itemsize
    if per_batch <= budget:
        # Fold several batch elements into one block; amortizes per-step cost
        # and makes the (n_tile, C) output store sublane-dense.
        n_fit = max(1, int(budget // per_batch))
        if n_fit >= N:
            n_tile = N
        elif n_fit >= 8:
            n_tile = (n_fit // 8) * 8          # sublane-legal partial-N blocks
        else:
            n_tile = n_fit
        return n_tile, C, HW
    if C > 128 and HW * 128 * itemsize <= budget:
        # Channel tiling in multiples of 128 keeps the output block lane-legal.
        c_tile = min(C, max(128, (int(budget // (HW * itemsize)) // 128) * 128))
        return 1, c_tile, HW
    # Spatial (lane) tiling; also tile channels for the huge-C x huge-HW corner
    # so the block never wildly exceeds the budget.
    c_tile = C
    if C > 128 and C * 128 * itemsize > budget:
        c_tile = max(128, (int(budget // (128 * itemsize)) // 128) * 128)
    hw_tile = min(HW, max(128, (int(budget // (c_tile * itemsize)) // 128) * 128))
    return 1, c_tile, hw_tile


def _maybe_split_for_cores(N, n_tile, C, c_tile, hw_tile, itemsize,
                           min_split_bytes=2 << 20):
    """Guarantee >=2 iterations on a 'parallel' grid axis when the block is big
    enough to matter, so both v7x TensorCores stream HBM (no-op on v5e/v6e)."""
    if pl.cdiv(N, n_tile) * pl.cdiv(C, c_tile) >= 2:
        return n_tile, c_tile
    if n_tile * c_tile * hw_tile * itemsize < min_split_bytes:
        return n_tile, c_tile                  # tiny problem: one block is best
    if N >= 2:
        half = max(1, n_tile // 2)
        if half >= 8:
            half = (half // 8) * 8
        return half, c_tile
    if C >= 256:
        return n_tile, max(128, ((c_tile // 2) // 128) * 128)
    return n_tile, c_tile


def global_avg_pool2d(x, *, vmem_block_budget_bytes=None):
    """GlobalAvgPool2d forward: x (N, C, H, W) -> (N, C) = mean over (H, W)."""
    N, C, H, W = x.shape
    HW = H * W
    itemsize = x.dtype.itemsize
    # Free metadata reshape (contiguous trailing dims): puts the reduced axis on
    # the 128-wide lane dimension without any HBM round trip.
    x3 = x.reshape(N, C, HW)

    # Generation-aware VMEM plan: ~48 MiB usable on v7x, ~96 MiB on v5e/v6e.
    safe_cap = (_vmem_capacity_bytes() * 3) // 4
    budget_cap = max(128 * 128 * itemsize, (safe_cap - (4 << 20)) // 3)
    if vmem_block_budget_bytes is None:
        budget = min(16 << 20, safe_cap // 4, budget_cap)
    else:
        budget = min(int(vmem_block_budget_bytes), budget_cap)

    n_tile, c_tile, hw_tile = _choose_tiles(N, C, HW, itemsize, budget)
    n_tile, c_tile = _maybe_split_for_cores(N, n_tile, C, c_tile, hw_tile, itemsize)

    grid = (pl.cdiv(N, n_tile), pl.cdiv(C, c_tile), pl.cdiv(HW, hw_tile))
    total_steps = grid[0] * grid[1] * grid[2]

    # Deepen input buffering when there are back-to-back DMAs to hide.
    num_buf = 3 if total_steps >= 3 else 2
    if num_buf == 3:
        in_spec = pl.BlockSpec((n_tile, c_tile, hw_tile),
                               lambda n, c, t: (n, c, t),
                               pipeline_mode=pl.Buffered(3))
    else:
        in_spec = pl.BlockSpec((n_tile, c_tile, hw_tile),
                               lambda n, c, t: (n, c, t))

    in_block_bytes = n_tile * c_tile * hw_tile * itemsize
    out_block_bytes = n_tile * c_tile * itemsize
    vmem_need = (num_buf * in_block_bytes + 2 * out_block_bytes
                 + n_tile * c_tile * 4)
    vmem_limit = int(min(safe_cap, max(16 << 20, vmem_need * 5 // 4 + (2 << 20))))

    ragged = (HW % hw_tile) != 0
    kernel = functools.partial(_gap_kernel, hw=HW, hw_tile=hw_tile,
                               ragged=ragged, inv_hw=1.0 / float(HW))

    cost = pl.CostEstimate(
        flops=N * C * HW,
        transcendentals=0,
        bytes_accessed=N * C * HW * itemsize + N * C * itemsize)

    return pl.pallas_call(
        kernel,
        out_shape=jax.ShapeDtypeStruct((N, C), x.dtype),
        grid=grid,
        in_specs=[in_spec],
        out_specs=pl.BlockSpec((n_tile, c_tile), lambda n, c, t: (n, c)),
        scratch_shapes=[pltpu.VMEM((n_tile, c_tile), jnp.float32)],
        compiler_params=pltpu.CompilerParams(
            dimension_semantics=("parallel", "parallel", "arbitrary"),
            vmem_limit_bytes=vmem_limit),
        cost_estimate=cost,
    )(x3)


if __name__ == "__main__":
    key = jax.random.PRNGKey(0)
    k1, k2, k3, k4 = jax.random.split(key, 4)

    # Primary shape consistent with the module: NCHW, batch=2, channels=4, 16x16.
    x = jax.random.normal(k1, (2, 4, 16, 16), jnp.float32)
    out = jax.block_until_ready(global_avg_pool2d(x))
    ref = jnp.mean(x, axis=(2, 3))
    assert out.shape == (2, 4)
    assert jnp.allclose(out, ref, atol=1e-4, rtol=1e-4), (
        f"max abs diff {float(jnp.max(jnp.abs(out - ref)))}")

    # Exercise HW tiling + ragged-last-tile mask + Buffered(3) (hw_tile=128 over 400).
    x2 = jax.random.normal(k2, (2, 20, 20, 20), jnp.float32)
    out2 = jax.block_until_ready(global_avg_pool2d(x2, vmem_block_budget_bytes=4096))
    ref2 = jnp.mean(x2, axis=(2, 3))
    assert jnp.allclose(out2, ref2, atol=1e-4, rtol=1e-4), (
        f"max abs diff {float(jnp.max(jnp.abs(out2 - ref2)))}")

    # Exercise the channel-tiling path (c_tile=128 over C=256).
    x3 = jax.random.normal(k3, (2, 256, 8, 8), jnp.float32)
    out3 = jax.block_until_ready(global_avg_pool2d(x3, vmem_block_budget_bytes=32768))
    ref3 = jnp.mean(x3, axis=(2, 3))
    assert jnp.allclose(out3, ref3, atol=1e-4, rtol=1e-4), (
        f"max abs diff {float(jnp.max(jnp.abs(out3 - ref3)))}")

    # Exercise batch folding into one block (n_tile=8 over N=16).
    x4 = jax.random.normal(k4, (16, 8, 8, 16), jnp.float32)
    out4 = jax.block_until_ready(global_avg_pool2d(x4, vmem_block_budget_bytes=32768))
    ref4 = jnp.mean(x4, axis=(2, 3))
    assert jnp.allclose(out4, ref4, atol=1e-4, rtol=1e-4), (
        f"max abs diff {float(jnp.max(jnp.abs(out4 - ref4)))}")

    print("KERNEL_OK")
</pallas_src>

<mosaic_0001>
module attributes {stable_mosaic.version = 11 : i64} {
  func.func @_gap_kernel(%arg0: i32, %arg1: i32, %arg2: i32, %arg3: memref<2x4x256xf32, #tpu.memory_space<vmem>>, %arg4: memref<2x4xf32, #tpu.memory_space<vmem>>, %arg5: memref<2x4xf32, #tpu.memory_space<vmem>>) attributes {dimension_semantics = [#tpu.dimension_semantics<parallel>, #tpu.dimension_semantics<parallel>, #tpu.dimension_semantics<arbitrary>], iteration_bounds = array<i64: 1, 1, 1>, scalar_prefetch = 0 : i64, scratch_operands = 1 : i64, tpu.core_type = #tpu.core_type<tc>, window_params = [{transform_indices = @transform_0, window_bounds = array<i64: 2, 4, 256>}, {transform_indices = @transform_1, window_bounds = array<i64: 2, 4>}]} {
    %c0_i32 = arith.constant 0 : i32
    %0 = arith.cmpi eq, %arg2, %c0_i32 : i32
    %1 = arith.extui %0 : i1 to i32
    %c0_i32_0 = arith.constant 0 : i32
    %2 = arith.cmpi ne, %1, %c0_i32_0 : i32
    scf.if %2 {
      %cst_9 = arith.constant 0.000000e+00 : f32
      %11 = vector.broadcast %cst_9 : f32 to vector<2x4xf32>
      %c0_10 = arith.constant 0 : index
      %c0_11 = arith.constant 0 : index
      %12 = vector.load %arg5[%c0_10, %c0_11] : memref<2x4xf32, #tpu.memory_space<vmem>>, vector<2x4xf32>
      tpu.vector_store %arg5[%c0_10, %c0_11], %11 {strides = array<i32>} : memref<2x4xf32, #tpu.memory_space<vmem>>, vector<2x4xf32>,
    } else {
    }
    %c0 = arith.constant 0 : index
    %c0_1 = arith.constant 0 : index
    %3 = vector.load %arg5[%c0, %c0_1] : memref<2x4xf32, #tpu.memory_space<vmem>>, vector<2x4xf32>
    %c0_2 = arith.constant 0 : index
    %c0_3 = arith.constant 0 : index
    %c0_4 = arith.constant 0 : index
    %4 = vector.load %arg3[%c0_2, %c0_3, %c0_4] : memref<2x4x256xf32, #tpu.memory_space<vmem>>, vector<2x4x256xf32>
    %cst = arith.constant dense<0.000000e+00> : vector<2x4xf32>
    %5 = vector.multi_reduction <add>, %4, %cst [2] : vector<2x4x256xf32> to vector<2x4xf32>
    %6 = arith.addf %3, %5 : vector<2x4xf32>
    %c0_5 = arith.constant 0 : index
    %c0_6 = arith.constant 0 : index
    %7 = vector.load %arg5[%c0_5, %c0_6] : memref<2x4xf32, #tpu.memory_space<vmem>>, vector<2x4xf32>
    tpu.vector_store %arg5[%c0_5, %c0_6], %6 {strides = array<i32>} : memref<2x4xf32, #tpu.memory_space<vmem>>, vector<2x4xf32>,
    %c0_i32_7 = arith.constant 0 : i32
    %8 = arith.cmpi eq, %arg2, %c0_i32_7 : i32
    %9 = arith.extui %8 : i1 to i32
    %c0_i32_8 = arith.constant 0 : i32
    %10 = arith.cmpi ne, %9, %c0_i32_8 : i32
    scf.if %10 {
      %c0_9 = arith.constant 0 : index
      %c0_10 = arith.constant 0 : index
      %11 = vector.load %arg5[%c0_9, %c0_10] : memref<2x4xf32, #tpu.memory_space<vmem>>, vector<2x4xf32>
      %cst_11 = arith.constant 3.906250e-03 : f32
      %12 = vector.broadcast %cst_11 : f32 to vector<2x4xf32>
      %13 = arith.mulf %11, %12 : vector<2x4xf32>
      %c0_12 = arith.constant 0 : index
      %c0_13 = arith.constant 0 : index
      %14 = vector.load %arg4[%c0_12, %c0_13] : memref<2x4xf32, #tpu.memory_space<vmem>>, vector<2x4xf32>
      tpu.vector_store %arg4[%c0_12, %c0_13], %13 {strides = array<i32>} : memref<2x4xf32, #tpu.memory_space<vmem>>, vector<2x4xf32>,
    } else {
    }
    return
  }
  func.func @transform_0(%arg0: i32, %arg1: i32, %arg2: i32) -> (i32, i32, i32) {
    %c0_i32 = arith.constant 0 : i32
    return %arg0, %arg1, %arg2 : i32, i32, i32
  }
  func.func @transform_1(%arg0: i32, %arg1: i32, %arg2: i32) -> (i32, i32) {
    %c0_i32 = arith.constant 0 : i32
    return %arg0, %arg1 : i32, i32
  }
}

</mosaic_0001>

<bundles_post_ra>
// kernel: tpu_custom_call.1
= control target key start
LH: loop header
LB: loop body
LE: loop exit
PB: predicated region body
PF: predicated region fallthrough
CT: control target
= control target key end

     0   :  { %6 = vsyncpa [#allocation4], 0  ;;  %s163_s0 = inlined_call_operand.hbm [shape: f32[2,4,256], index: 0, kind: input, shape index: {}]   ;;  %s164_s1 = inlined_call_operand.hbm [shape: f32[2,4], index: 1, kind: output, shape index: {}]  }
   0x1   :  { %7 = vsyncpa [#allocation5], 0  ;;  %s139_s6 = smov [#allocation3]  }
   0x2   :  { %s13_s7 = sshll.u32 %s139_s6, 4  ;;  %s14_s7 = int_to_ptr.vmem [resolvable:$true] %s13_s7 }
   0x3   :  { %s103_s8 = scalar_lea.vmem %s14_s7, 256  ;;  %p108_p1 = scmp.lt.s32.totalorder %s14_s7, %s14_s7 }
   0x4   :  { %p104_p0 = scmp.ne.s32.totalorder %s14_s7, %s103_s8  ;;  %p109_p2 = scmp.lt.s32.totalorder %s103_s8, %s103_s8 }
   0x6   :  { %p110_p3 = por %p109_p2, %p108_p1 }
   0x8   :  { %p111_p4 = pnand %p110_p3, %p104_p0 }
   0xa   :  { %114 = shalt.err (!%p111_p4)
}
   0xb   :  { %s140_s9 = smov 128   ;;  %s141_s10 = smov 8  }
   0xc   :  { %19 = dma.hbm_to_vmem [thread:$0]  %s163_s0, 256, %s14_s7, [#allocation4], %s140_s9, %s140_s9, %s141_s10  }
   0xd   :  { %135 = dma.done.wait [#allocation4], 256  }
   0xe   :  { %136 = vsyncadd [#allocation4], 4294967040  ;;  %vm38_vm0 = vcmask 1043456   ;;  %v30_v0 = vld [vmem:[#allocation3] sm:$0xff]  ;;  %v31_v1 = vld [vmem:[#allocation3 + $0x8] sm:$0xff]  ;;  %vm27_vm1 = vcmask 25600   ;;  %v51_v11 = vlaneseq }
   0xf   :  { %v34_v2 = vcombine.high %v30_v0, %v30_v0  ;;  %v39_v3 = vsel %vm38_vm0, %v30_v0, 0.0  ;;  %v35_v4 = vcombine.high %v31_v1, %v31_v1  ;;  %v44_v6 = vsel %vm38_vm0, %v31_v1, 0.0  ;;  %s143_s0 = smov [#allocation6]  }
  0x10   :  { %v142_v10 = vmov 0.0   ;;  %v52_v12 = vand.u32 127, %v51_v11  ;;  %v54_v13 = vshrl.u32 %v51_v11, 7  ;;  %vm61_vm2 = vcmask 1041409   ;;  %s79_s13 = sshll.u32 %s143_s0, 4  ;;  %s80_s13 = int_to_ptr.vmem [resolvable:$true] %s79_s13 }
  0x11   :  { %v40_v5 = vsel %vm38_vm0, %v34_v2, 0.0  ;;  %v45_v7 = vsel %vm38_vm0, %v35_v4, 0.0  ;;  %28 = vst.msk [vmem:[#allocation2] sm:$0x3] %vm27_vm1, %v142_v10  ;;  %s115_s14 = scalar_lea.vmem %s80_s13, 32  ;;  %p120_p6 = scmp.lt.s32.totalorder %s80_s13, %s80_s13 }
  0x12   :  { %v41_v8 = vadd.f32 %v40_v5, %v39_v3  ;;  %v46_v9 = vadd.f32 %v45_v7, %v44_v6  ;;  %v55_v15 = vsub.s32 %v52_v12, %v54_v13  ;;  %p116_p5 = scmp.ne.s32.totalorder %s80_s13, %s115_s14  ;;  %p121_p7 = scmp.lt.s32.totalorder %s115_s14, %s115_s14 }
  0x14   :  { %42 = vadd.xlane.f32.xlu0 %v41_v8  ;;  %p122_p8 = por %p121_p7, %p120_p6 }
  0x16   :  { %p123_p9 = pnand %p122_p8, %p116_p5 }
  0x18   :  { %47 = vadd.xlane.f32.xlu0 %v46_v9  ;;  %v29_v19 = vld [vmem:[#allocation2] sm:$0x3] }
  0x9d   :  { %v43_v14 = vpop.xlane.xlu0 %42 }
  0x9e   :  { %v56_v17 = vrot.slane %v43_v14, %v55_v15 }
  0xa1   :  { %v48_v16 = vpop.xlane.xlu0 %47 }
  0xa2   :  { %v60_v18 = vrot.slane %v48_v16, %v55_v15 }
  0xa4   :  { %v62_v20 = vsel %vm61_vm2, %v60_v18, %v56_v17 }
  0xa5   :  { %v64_v21 = vadd.f32 %v62_v20, %v29_v19 }
  0xa7   :  { %66 = vst.msk [vmem:[#allocation2] sm:$0x3] %vm27_vm1, %v64_v21 }
  0xae   :  { %v70_v22 = vld [vmem:[#allocation2] sm:$0x3] }
  0xaf   :  { %v71_v23 = vmul.f32 0.00390625, %v70_v22 }
  0xb1   :  { %72 = vst.msk [vmem:[#allocation6] sm:$0x3] %vm27_vm1, %v71_v23 }
  0xb2   :  { %126 = shalt.err (!%p123_p9)
}
  0xb3   :  { %82 = dma.vmem_to_hbm [thread:$0]  %s80_s13, 32, %s164_s1, [#allocation5]  }
  0xb4   :  { %137 = dma.done.wait [#allocation5], 32  }
  0xb5   :  { %138 = vsyncadd [#allocation5], 4294967264 }
  0xb6   :  { %86 = vsyncpa [#allocation4], 1 }
  0xb7   :  { %87 = vsyncpa [#allocation5], 1 }

</bundles_post_ra>
